<compile_context>
chip_gen: v7x
topology: tpu7x:2x2x1
jax: 0.10.0
libtpu: 0.0.40
codegen_flags: <defaults>
</compile_context>

<pallas_src>
import functools

import jax
import jax.numpy as jnp
from jax.experimental import pallas as pl
from jax.experimental.pallas import tpu as pltpu


COMPUTE_DTYPE = jnp.bfloat16            # MXU operand dtype (accumulation is always f32)
_NEG_BIG = -1e9                         # f32 logit for padded query channels -> weight 0
_VMEM_LIMIT_BYTES = 48 * 1024 * 1024    # <= physical VMEM on every generation (v7x: 64 MiB)
_FUSED_VMEM_BUDGET = 24 * 1024 * 1024   # above this, switch to the spatially tiled path


def _round_up(x, m):
    return (x + m - 1) // m * m


def _auto_tile(hw):
    for t in (2048, 1024, 512, 256, 128):
        if hw % t == 0:
            return t
    return None  # TODO(synk): pad/mask hw for shapes with no 128-multiple divisor


# --------------------------------------------------------------------------------------
# Whole-image fused kernel (one image per grid step).
# --------------------------------------------------------------------------------------
def _fused_kernel(x_ref, wp_ref, bp_ref, maskT_ref, wr_ref, br_ref, o_ref, *,
                  head_count, hkc_pad, hvc_pad, compute_dtype):
    x = x_ref[0]                                                    # (c_in, hw)
    xc = x.astype(compute_dtype)
    hw = x.shape[-1]
    kcp = head_count * hkc_pad
    vcp = head_count * hvc_pad

    # Fused K/Q/V projection: ONE MXU matmul; the three biases ride in as a (P,1) f32 add.
    proj = jnp.dot(wp_ref[...], xc, preferred_element_type=jnp.float32) + bp_ref[...]

    keys = proj[:kcp]                                               # (kcp, hw)
    queries = proj[kcp:2 * kcp].reshape(head_count, hkc_pad, hw)    # (H, hkc_pad, hw)
    values = proj[2 * kcp:]                                         # (vcp, hw)

    # Key softmax over hw: exp applied full-size, the 1/sum is folded into the tiny
    # (kcp, vcp) context below (saves a kcp*hw VPU pass + intermediate).
    k_max = jnp.max(keys, axis=-1, keepdims=True)
    k_exp = jnp.exp(keys - k_max)
    k_sum = jnp.sum(k_exp, axis=-1, keepdims=True)                  # (kcp, 1)

    # Query softmax over per-head channels (f32; padded rows have -1e9 bias -> exactly 0).
    q_max = jnp.max(queries, axis=1, keepdims=True)
    q_exp = jnp.exp(queries - q_max)
    q_sm = q_exp * pl.reciprocal(jnp.sum(q_exp, axis=1, keepdims=True), approx=True)
    q_sm = q_sm.reshape(kcp, hw)

    # Merged context for ALL heads in one matmul contracting the shared hw (lane) axis —
    # same pattern as flash-attention QK^T, so no hw-length transpose is materialized.
    ctx_kv = jax.lax.dot_general(
        k_exp.astype(compute_dtype), values.astype(compute_dtype),
        dimension_numbers=(((1,), (1,)), ((), ())),
        preferred_element_type=jnp.float32)                         # (kcp, vcp)
    # Block-diagonal head mask + key-softmax denominator applied on the tiny context.
    ctx_kv = ctx_kv * maskT_ref[...] * pl.reciprocal(k_sum, approx=True)
    ctx = jnp.transpose(ctx_kv).astype(compute_dtype)               # tiny (vcp, kcp)

    attended = jnp.dot(ctx, q_sm.astype(compute_dtype),
                       preferred_element_type=jnp.float32)          # (vcp, hw)
    reproj = jnp.dot(wr_ref[...], attended.astype(compute_dtype),
                     preferred_element_type=jnp.float32)            # (c_in, hw)
    o_ref[0] = (reproj + br_ref[...] + x.astype(jnp.float32)).astype(o_ref.dtype)


# --------------------------------------------------------------------------------------
# Spatially tiled two-pass path (online softmax over HW tiles).
# --------------------------------------------------------------------------------------
def _context_kernel(x_ref, wkv_ref, bkv_ref, maskT_ref, ctx_ref, m_ref, l_ref, acc_ref, *,
                    kcp, compute_dtype):
    """Pass 1: accumulate ctx[k, v] = sum_p softmax_hw(key)[k,p] * value[v,p] over hw tiles."""
    t = pl.program_id(1)

    @pl.when(t == 0)
    def _():
        m_ref[...] = jnp.full(m_ref.shape, -jnp.inf, m_ref.dtype)
        l_ref[...] = jnp.zeros_like(l_ref)
        acc_ref[...] = jnp.zeros_like(acc_ref)

    x = x_ref[0]                                                    # (c_in, tile)
    kv = jnp.dot(wkv_ref[...], x.astype(compute_dtype),
                 preferred_element_type=jnp.float32) + bkv_ref[...]
    k = kv[:kcp]
    v = kv[kcp:]

    m_old = m_ref[...]
    m_new = jnp.maximum(m_old, jnp.max(k, axis=-1, keepdims=True))
    alpha = jnp.exp(m_old - m_new)                                  # (kcp, 1)
    p = jnp.exp(k - m_new)                                          # (kcp, tile)
    l_ref[...] = alpha * l_ref[...] + jnp.sum(p, axis=-1, keepdims=True)
    pv = jax.lax.dot_general(
        p.astype(compute_dtype), v.astype(compute_dtype),
        dimension_numbers=(((1,), (1,)), ((), ())),
        preferred_element_type=jnp.float32)                         # (kcp, vcp)
    acc_ref[...] = alpha * acc_ref[...] + pv
    m_ref[...] = m_new

    @pl.when(t == pl.num_programs(1) - 1)
    def _():
        ctx_ref[0] = (acc_ref[...] * maskT_ref[...]
                      * pl.reciprocal(l_ref[...], approx=True))


def _apply_kernel(x_ref, ctx_ref, wq_ref, bq_ref, wr_ref, br_ref, o_ref, *,
                  head_count, hkc_pad, compute_dtype):
    """Pass 2: per-tile query softmax, attend with precomputed context, reproject, residual."""
    x = x_ref[0]                                                    # (c_in, tile)
    tile = x.shape[-1]
    kcp = head_count * hkc_pad

    q = jnp.dot(wq_ref[...], x.astype(compute_dtype),
                preferred_element_type=jnp.float32) + bq_ref[...]   # (kcp, tile)
    q3 = q.reshape(head_count, hkc_pad, tile)
    q_max = jnp.max(q3, axis=1, keepdims=True)
    q_exp = jnp.exp(q3 - q_max)
    q_sm = q_exp * pl.reciprocal(jnp.sum(q_exp, axis=1, keepdims=True), approx=True)
    q_sm = q_sm.reshape(kcp, tile)

    ctx = jnp.transpose(ctx_ref[0]).astype(compute_dtype)           # tiny (vcp, kcp)
    attended = jnp.dot(ctx, q_sm.astype(compute_dtype),
                       preferred_element_type=jnp.float32)          # (vcp, tile)
    reproj = jnp.dot(wr_ref[...], attended.astype(compute_dtype),
                     preferred_element_type=jnp.float32)            # (c_in, tile)
    o_ref[0] = (reproj + br_ref[...] + x.astype(jnp.float32)).astype(o_ref.dtype)


# --------------------------------------------------------------------------------------
# Wrapper
# --------------------------------------------------------------------------------------
def _pad_per_head(wt, bt, head_count, per_head, per_head_pad, pad_bias):
    """Pad each head's channel block of a (H*per_head, c_in) 1x1-conv weight to per_head_pad rows."""
    c_in = wt.shape[1]
    pad = per_head_pad - per_head
    w3 = wt.reshape(head_count, per_head, c_in)
    b3 = bt.reshape(head_count, per_head, 1)
    if pad:
        w3 = jnp.pad(w3, ((0, 0), (0, pad), (0, 0)))
        b3 = jnp.pad(b3, ((0, 0), (0, pad), (0, 0)), constant_values=pad_bias)
    return (w3.reshape(head_count * per_head_pad, c_in),
            b3.reshape(head_count * per_head_pad, 1))


def efficient_attention(x, params, *, key_channels, head_count, value_channels,
                        compute_dtype=COMPUTE_DTYPE, spatial_tile=None):
    """x: (N, C_in, H, W).  Returns (N, C_in, H, W) in x.dtype."""
    n, c_in, h, w = x.shape
    hw = h * w
    assert key_channels % head_count == 0 and value_channels % head_count == 0

    hkc = key_channels // head_count
    hvc = value_channels // head_count
    # TODO(synk): consider 16-row per-head padding for bf16 operands if relayouts show up.
    hkc_pad = _round_up(hkc, 8)
    hvc_pad = _round_up(hvc, 8)
    kcp = head_count * hkc_pad
    vcp = head_count * hvc_pad
    p_total = 2 * kcp + vcp

    wk, bk = params["keys"]
    wq, bq = params["queries"]
    wv, bv = params["values"]
    wr, br = params["reprojection"]

    # ---- wrapper-side weight layout (tiny, done once; no activation traffic) ----
    wk_p, bk_p = _pad_per_head(wk, bk, head_count, hkc, hkc_pad, 0.0)
    wq_p, bq_p = _pad_per_head(wq, bq, head_count, hkc, hkc_pad, _NEG_BIG)
    wv_p, bv_p = _pad_per_head(wv, bv, head_count, hvc, hvc_pad, 0.0)

    wr3 = jnp.pad(wr.reshape(c_in, head_count, hvc), ((0, 0), (0, 0), (0, hvc_pad - hvc)))
    wr_p = wr3.reshape(c_in, vcp).astype(compute_dtype)
    br_p = br.astype(jnp.float32)                                   # (c_in, 1)

    k_head = jnp.arange(kcp) // hkc_pad
    v_head = jnp.arange(vcp) // hvc_pad
    maskT = (k_head[:, None] == v_head[None, :]).astype(jnp.float32)  # (kcp, vcp) block-diag

    # x passed straight through — no concat / pad / extra HBM pass; blocks equal full dims.
    x_flat = x.reshape(n, c_in, hw)
    out_dtype = x.dtype

    # ---- path selection: whole-image fused kernel vs two-pass spatially tiled ----
    fused_vmem_est = (4 * c_in + 3 * p_total) * hw * 4              # rough f32 working set
    if spatial_tile is None and fused_vmem_est > _FUSED_VMEM_BUDGET:
        spatial_tile = _auto_tile(hw)                               # None -> stay fused
    if spatial_tile is not None and spatial_tile != hw:
        assert hw % spatial_tile == 0 and spatial_tile % 128 == 0, "bad spatial_tile"

    if spatial_tile is None or spatial_tile == hw:
        wp = jnp.concatenate([wk_p, wq_p, wv_p], axis=0).astype(compute_dtype)  # (P, c_in)
        bp = jnp.concatenate([bk_p, bq_p, bv_p], axis=0)                        # (P, 1) f32

        kernel = functools.partial(
            _fused_kernel, head_count=head_count, hkc_pad=hkc_pad,
            hvc_pad=hvc_pad, compute_dtype=compute_dtype)
        full1 = lambda a: pl.BlockSpec(a.shape, lambda b: (0, 0))

        flops = n * 2 * hw * (p_total * c_in + 2 * kcp * vcp + c_in * vcp)
        out = pl.pallas_call(
            kernel,
            out_shape=jax.ShapeDtypeStruct((n, c_in, hw), out_dtype),
            grid=(n,),
            in_specs=[
                pl.BlockSpec((1, c_in, hw), lambda b: (b, 0, 0)),
                full1(wp), full1(bp), full1(maskT), full1(wr_p), full1(br_p),
            ],
            out_specs=pl.BlockSpec((1, c_in, hw), lambda b: (b, 0, 0)),
            compiler_params=pltpu.CompilerParams(
                dimension_semantics=("parallel",),
                vmem_limit_bytes=_VMEM_LIMIT_BYTES),
            cost_estimate=pl.CostEstimate(
                flops=int(flops),
                transcendentals=int(n * 2 * kcp * hw),
                bytes_accessed=int(2 * n * c_in * hw * x.dtype.itemsize)),
        )(x_flat, wp, bp, maskT, wr_p, br_p)
        return out.reshape(n, c_in, h, w)

    # ---- spatially tiled two-pass path ----
    tile = spatial_tile
    num_t = hw // tile

    wkv = jnp.concatenate([wk_p, wv_p], axis=0).astype(compute_dtype)   # (kcp+vcp, c_in)
    bkv = jnp.concatenate([bk_p, bv_p], axis=0)                         # (kcp+vcp, 1) f32
    wq_c = wq_p.astype(compute_dtype)
    full2 = lambda a: pl.BlockSpec(a.shape, lambda b, t: (0, 0))

    ctx = pl.pallas_call(
        functools.partial(_context_kernel, kcp=kcp, compute_dtype=compute_dtype),
        out_shape=jax.ShapeDtypeStruct((n, kcp, vcp), jnp.float32),
        grid=(n, num_t),
        in_specs=[
            pl.BlockSpec((1, c_in, tile), lambda b, t: (b, 0, t)),
            full2(wkv), full2(bkv), full2(maskT),
        ],
        out_specs=pl.BlockSpec((1, kcp, vcp), lambda b, t: (b, 0, 0)),
        scratch_shapes=[pltpu.VMEM((kcp, 1), jnp.float32),
                        pltpu.VMEM((kcp, 1), jnp.float32),
                        pltpu.VMEM((kcp, vcp), jnp.float32)],
        compiler_params=pltpu.CompilerParams(
            dimension_semantics=("parallel", "arbitrary"),
            vmem_limit_bytes=_VMEM_LIMIT_BYTES),
    )(x_flat, wkv, bkv, maskT)

    out = pl.pallas_call(
        functools.partial(_apply_kernel, head_count=head_count, hkc_pad=hkc_pad,
                          compute_dtype=compute_dtype),
        out_shape=jax.ShapeDtypeStruct((n, c_in, hw), out_dtype),
        grid=(n, num_t),
        in_specs=[
            pl.BlockSpec((1, c_in, tile), lambda b, t: (b, 0, t)),
            pl.BlockSpec((1, kcp, vcp), lambda b, t: (b, 0, 0)),
            full2(wq_c), full2(bq_p), full2(wr_p), full2(br_p),
        ],
        out_specs=pl.BlockSpec((1, c_in, tile), lambda b, t: (b, 0, t)),
        compiler_params=pltpu.CompilerParams(
            dimension_semantics=("parallel", "parallel"),
            vmem_limit_bytes=_VMEM_LIMIT_BYTES),
    )(x_flat, ctx, wq_c, bq_p, wr_p, br_p)
    return out.reshape(n, c_in, h, w)


# --------------------------------------------------------------------------------------
# Pure-JAX reference (mirrors the PyTorch forward exactly) + param init + self-test
# --------------------------------------------------------------------------------------
def _reference(x, params, *, key_channels, head_count, value_channels):
    n, c_in, h, w = x.shape
    hw = h * w
    xf = x.reshape(n, c_in, hw)

    def proj(wb):
        wt, bt = wb
        return jnp.einsum("oc,ncp->nop", wt, xf) + bt[None, :, :]

    keys = proj(params["keys"])
    queries = proj(params["queries"])
    values = proj(params["values"])

    hkc = key_channels // head_count
    hvc = value_channels // head_count
    outs = []
    for i in range(head_count):
        key = jax.nn.softmax(keys[:, i * hkc:(i + 1) * hkc, :], axis=2)
        query = jax.nn.softmax(queries[:, i * hkc:(i + 1) * hkc, :], axis=1)
        value = values[:, i * hvc:(i + 1) * hvc, :]
        context = jnp.einsum("nkp,nvp->nkv", key, value)
        attended = jnp.einsum("nkv,nkp->nvp", context, query)
        outs.append(attended)
    agg = jnp.concatenate(outs, axis=1)
    wr, br = params["reprojection"]
    reproj = jnp.einsum("ov,nvp->nop", wr, agg) + br[None, :, :]
    return (reproj + xf).reshape(n, c_in, h, w)


def _init_params(key, in_channels, key_channels, value_channels):
    ks = jax.random.split(key, 8)

    def conv1x1(kw, kb, c_out, c_in):
        wt = 0.1 * jax.random.normal(kw, (c_out, c_in), jnp.float32)
        bt = 0.1 * jax.random.normal(kb, (c_out, 1), jnp.float32)
        return (wt, bt)

    return {
        "keys":         conv1x1(ks[0], ks[1], key_channels, in_channels),
        "queries":      conv1x1(ks[2], ks[3], key_channels, in_channels),
        "values":       conv1x1(ks[4], ks[5], value_channels, in_channels),
        "reprojection": conv1x1(ks[6], ks[7], in_channels, value_channels),
    }


if __name__ == "__main__":
    in_channels = 4
    key_channels = 8
    head_count = 2
    value_channels = 8
    n, h, w = 2, 16, 16

    root = jax.random.PRNGKey(0)
    k_x, k_p = jax.random.split(root)
    x = jax.random.normal(k_x, (n, in_channels, h, w), jnp.float32)
    params = _init_params(k_p, in_channels, key_channels, value_channels)

    ref = _reference(x, params, key_channels=key_channels, head_count=head_count,
                     value_channels=value_channels)

    # Default path (whole-image fused kernel at this small shape).
    out = jax.block_until_ready(efficient_attention(
        x, params, key_channels=key_channels, head_count=head_count,
        value_channels=value_channels))
    assert out.shape == (n, in_channels, h, w)
    err = float(jnp.max(jnp.abs(out - ref)))
    assert jnp.allclose(out, ref, atol=2e-2, rtol=2e-2), f"fused mismatch (max_err={err})"

    # Spatially tiled two-pass path (what large H*W / v7x uses), forced at tile=128.
    out_t = jax.block_until_ready(efficient_attention(
        x, params, key_channels=key_channels, head_count=head_count,
        value_channels=value_channels, spatial_tile=128))
    err_t = float(jnp.max(jnp.abs(out_t - ref)))
    assert jnp.allclose(out_t, ref, atol=2e-2, rtol=2e-2), f"tiled mismatch (max_err={err_t})"

    print("KERNEL_OK")
</pallas_src>

<mosaic_0001>
module attributes {stable_mosaic.version = 11 : i64} {
  func.func @_fused_kernel(%arg0: i32, %arg1: memref<1x4x256xf32, #tpu.memory_space<vmem>>, %arg2: memref<48x4xbf16, #tpu.memory_space<vmem>>, %arg3: memref<48x1xf32, #tpu.memory_space<vmem>>, %arg4: memref<16x16xf32, #tpu.memory_space<vmem>>, %arg5: memref<4x16xbf16, #tpu.memory_space<vmem>>, %arg6: memref<4x1xf32, #tpu.memory_space<vmem>>, %arg7: memref<1x4x256xf32, #tpu.memory_space<vmem>>) attributes {dimension_semantics = [#tpu.dimension_semantics<parallel>], iteration_bounds = array<i64: 2>, scalar_prefetch = 0 : i64, scratch_operands = 0 : i64, tpu.core_type = #tpu.core_type<tc>, window_params = [{transform_indices = @transform_0, window_bounds = array<i64: 1, 4, 256>}, {pipeline_mode = #tpu.pipeline_mode<synchronous>, transform_indices = @transform_1, window_bounds = array<i64: 48, 4>}, {pipeline_mode = #tpu.pipeline_mode<synchronous>, transform_indices = @transform_2, window_bounds = array<i64: 48, 1>}, {pipeline_mode = #tpu.pipeline_mode<synchronous>, transform_indices = @transform_3, window_bounds = array<i64: 16, 16>}, {pipeline_mode = #tpu.pipeline_mode<synchronous>, transform_indices = @transform_4, window_bounds = array<i64: 4, 16>}, {pipeline_mode = #tpu.pipeline_mode<synchronous>, transform_indices = @transform_5, window_bounds = array<i64: 4, 1>}, {transform_indices = @transform_6, window_bounds = array<i64: 1, 4, 256>}]} {
    %c0 = arith.constant 0 : index
    %c0_0 = arith.constant 0 : index
    %c0_1 = arith.constant 0 : index
    %0 = vector.load %arg1[%c0, %c0_0, %c0_1] : memref<1x4x256xf32, #tpu.memory_space<vmem>>, vector<1x4x256xf32>
    %1 = vector.shape_cast %0 : vector<1x4x256xf32> to vector<4x256xf32>
    %2 = arith.truncf %1 : vector<4x256xf32> to vector<4x256xbf16>
    %c0_2 = arith.constant 0 : index
    %c0_3 = arith.constant 0 : index
    %3 = vector.load %arg2[%c0_2, %c0_3] : memref<48x4xbf16, #tpu.memory_space<vmem>>, vector<48x4xbf16>
    %cst = arith.constant dense<0.000000e+00> : vector<48x256xf32>
    %4 = tpu.matmul %3, %2, %cst {dimension_numbers = #tpu.dot_dimension_numbers<[1], [0], [0], [1], [0, 0, 1, 1], [], []>} : vector<48x4xbf16>, vector<4x256xbf16>, vector<48x256xf32> -> vector<48x256xf32>
    %c0_4 = arith.constant 0 : index
    %c0_5 = arith.constant 0 : index
    %5 = vector.load %arg3[%c0_4, %c0_5] : memref<48x1xf32, #tpu.memory_space<vmem>>, vector<48x1xf32>
    %6 = vector.broadcast %5 : vector<48x1xf32> to vector<48x256xf32>
    %7 = arith.addf %4, %6 : vector<48x256xf32>
    %8 = vector.extract_strided_slice %7 {offsets = [0, 0], sizes = [16, 256], strides = [1, 1]} : vector<48x256xf32> to vector<16x256xf32>
    %9 = vector.extract_strided_slice %7 {offsets = [16, 0], sizes = [16, 256], strides = [1, 1]} : vector<48x256xf32> to vector<16x256xf32>
    %10 = vector.shape_cast %9 : vector<16x256xf32> to vector<2x8x256xf32>
    %11 = vector.extract_strided_slice %7 {offsets = [32, 0], sizes = [16, 256], strides = [1, 1]} : vector<48x256xf32> to vector<16x256xf32>
    %cst_6 = arith.constant dense<0xFF800000> : vector<16xf32>
    %12 = vector.multi_reduction <maximumf>, %8, %cst_6 [1] : vector<16x256xf32> to vector<16xf32>
    %13 = vector.shape_cast %12 : vector<16xf32> to vector<16x1xf32>
    %14 = vector.broadcast %13 : vector<16x1xf32> to vector<16x256xf32>
    %15 = arith.subf %8, %14 : vector<16x256xf32>
    %16 = math.exp %15 : vector<16x256xf32>
    %cst_7 = arith.constant dense<0.000000e+00> : vector<16xf32>
    %17 = vector.multi_reduction <add>, %16, %cst_7 [1] : vector<16x256xf32> to vector<16xf32>
    %18 = vector.shape_cast %17 : vector<16xf32> to vector<16x1xf32>
    %cst_8 = arith.constant dense<0xFF800000> : vector<2x256xf32>
    %19 = vector.multi_reduction <maximumf>, %10, %cst_8 [1] : vector<2x8x256xf32> to vector<2x256xf32>
    %20 = vector.shape_cast %19 : vector<2x256xf32> to vector<2x1x256xf32>
    %21 = vector.broadcast %20 : vector<2x1x256xf32> to vector<2x8x256xf32>
    %22 = arith.subf %10, %21 : vector<2x8x256xf32>
    %23 = math.exp %22 : vector<2x8x256xf32>
    %cst_9 = arith.constant dense<0.000000e+00> : vector<2x256xf32>
    %24 = vector.multi_reduction <add>, %23, %cst_9 [1] : vector<2x8x256xf32> to vector<2x256xf32>
    %25 = vector.shape_cast %24 : vector<2x256xf32> to vector<2x1x256xf32>
    %26 = tpu.reciprocal %25 {approx = true} : vector<2x1x256xf32> -> vector<2x1x256xf32>
    %27 = vector.broadcast %26 : vector<2x1x256xf32> to vector<2x8x256xf32>
    %28 = arith.mulf %23, %27 : vector<2x8x256xf32>
    %29 = vector.shape_cast %28 : vector<2x8x256xf32> to vector<16x256xf32>
    %30 = arith.truncf %16 : vector<16x256xf32> to vector<16x256xbf16>
    %31 = arith.truncf %11 : vector<16x256xf32> to vector<16x256xbf16>
    %cst_10 = arith.constant dense<0.000000e+00> : vector<16x16xf32>
    %32 = tpu.matmul %30, %31, %cst_10 {dimension_numbers = #tpu.dot_dimension_numbers<[1], [1], [0], [0], [0, 0, 1, 0], [], []>} : vector<16x256xbf16>, vector<16x256xbf16>, vector<16x16xf32> -> vector<16x16xf32>
    %c0_11 = arith.constant 0 : index
    %c0_12 = arith.constant 0 : index
    %33 = vector.load %arg4[%c0_11, %c0_12] : memref<16x16xf32, #tpu.memory_space<vmem>>, vector<16x16xf32>
    %34 = arith.mulf %32, %33 : vector<16x16xf32>
    %35 = tpu.reciprocal %18 {approx = true} : vector<16x1xf32> -> vector<16x1xf32>
    %36 = vector.broadcast %35 : vector<16x1xf32> to vector<16x16xf32>
    %37 = arith.mulf %34, %36 : vector<16x16xf32>
    %38 = tpu.transpose %37, [1, 0] : vector<16x16xf32> -> vector<16x16xf32>
    %39 = arith.truncf %38 : vector<16x16xf32> to vector<16x16xbf16>
    %40 = arith.truncf %29 : vector<16x256xf32> to vector<16x256xbf16>
    %cst_13 = arith.constant dense<0.000000e+00> : vector<16x256xf32>
    %41 = tpu.matmul %39, %40, %cst_13 {dimension_numbers = #tpu.dot_dimension_numbers<[1], [0], [0], [1], [0, 0, 1, 1], [], []>} : vector<16x16xbf16>, vector<16x256xbf16>, vector<16x256xf32> -> vector<16x256xf32>
    %c0_14 = arith.constant 0 : index
    %c0_15 = arith.constant 0 : index
    %42 = vector.load %arg5[%c0_14, %c0_15] : memref<4x16xbf16, #tpu.memory_space<vmem>>, vector<4x16xbf16>
    %43 = arith.truncf %41 : vector<16x256xf32> to vector<16x256xbf16>
    %cst_16 = arith.constant dense<0.000000e+00> : vector<4x256xf32>
    %44 = tpu.matmul %42, %43, %cst_16 {dimension_numbers = #tpu.dot_dimension_numbers<[1], [0], [0], [1], [0, 0, 1, 1], [], []>} : vector<4x16xbf16>, vector<16x256xbf16>, vector<4x256xf32> -> vector<4x256xf32>
    %c0_17 = arith.constant 0 : index
    %c0_18 = arith.constant 0 : index
    %45 = vector.load %arg6[%c0_17, %c0_18] : memref<4x1xf32, #tpu.memory_space<vmem>>, vector<4x1xf32>
    %46 = vector.broadcast %45 : vector<4x1xf32> to vector<4x256xf32>
    %47 = arith.addf %44, %46 : vector<4x256xf32>
    %48 = arith.addf %47, %1 : vector<4x256xf32>
    %c0_19 = arith.constant 0 : index
    %c0_20 = arith.constant 0 : index
    %c0_21 = arith.constant 0 : index
    %49 = vector.load %arg7[%c0_19, %c0_20, %c0_21] : memref<1x4x256xf32, #tpu.memory_space<vmem>>, vector<1x4x256xf32>
    %50 = vector.shape_cast %49 : vector<1x4x256xf32> to vector<4x256xf32>
    %51 = vector.shape_cast %48 : vector<4x256xf32> to vector<1x4x256xf32>
    tpu.vector_store %arg7[%c0_19, %c0_20, %c0_21], %51 {strides = array<i32>} : memref<1x4x256xf32, #tpu.memory_space<vmem>>, vector<1x4x256xf32>,
    return
  }
  func.func @transform_0(%arg0: i32) -> (i32, i32, i32) {
    %c0_i32 = arith.constant 0 : i32
    %c0_i32_0 = arith.constant 0 : i32
    %c0_i32_1 = arith.constant 0 : i32
    return %arg0, %c0_i32, %c0_i32_0 : i32, i32, i32
  }
  func.func @transform_1(%arg0: i32) -> (i32, i32) {
    %c0_i32 = arith.constant 0 : i32
    %c0_i32_0 = arith.constant 0 : i32
    %c0_i32_1 = arith.constant 0 : i32
    return %c0_i32, %c0_i32_0 : i32, i32
  }
  func.func @transform_2(%arg0: i32) -> (i32, i32) {
    %c0_i32 = arith.constant 0 : i32
    %c0_i32_0 = arith.constant 0 : i32
    %c0_i32_1 = arith.constant 0 : i32
    return %c0_i32, %c0_i32_0 : i32, i32
  }
  func.func @transform_3(%arg0: i32) -> (i32, i32) {
    %c0_i32 = arith.constant 0 : i32
    %c0_i32_0 = arith.constant 0 : i32
    %c0_i32_1 = arith.constant 0 : i32
    return %c0_i32, %c0_i32_0 : i32, i32
  }
  func.func @transform_4(%arg0: i32) -> (i32, i32) {
    %c0_i32 = arith.constant 0 : i32
    %c0_i32_0 = arith.constant 0 : i32
    %c0_i32_1 = arith.constant 0 : i32
    return %c0_i32, %c0_i32_0 : i32, i32
  }
  func.func @transform_5(%arg0: i32) -> (i32, i32) {
    %c0_i32 = arith.constant 0 : i32
    %c0_i32_0 = arith.constant 0 : i32
    %c0_i32_1 = arith.constant 0 : i32
    return %c0_i32, %c0_i32_0 : i32, i32
  }
  func.func @transform_6(%arg0: i32) -> (i32, i32, i32) {
    %c0_i32 = arith.constant 0 : i32
    %c0_i32_0 = arith.constant 0 : i32
    %c0_i32_1 = arith.constant 0 : i32
    return %arg0, %c0_i32, %c0_i32_0 : i32, i32, i32
  }
}

</mosaic_0001>

<bundles_post_ra>
// kernel: tpu_custom_call.1
= control target key start
LH: loop header
LB: loop body
LE: loop exit
PB: predicated region body
PF: predicated region fallthrough
CT: control target
= control target key end

     0   :  { %11 = vsyncpa [#allocation3], 0  ;;  %s1112_s0 = inlined_call_operand.vmem [shape: f32[2,4,256], index: 0, kind: input, shape index: {}]   ;;  %s1113_s1 = inlined_call_operand.vmem [shape: bf16[48,4], index: 1, kind: input, shape index: {}]   ;;  %s1114_s2 = inlined_call_operand.vmem [shape: f32[48,1], index: 2, kind: input, shape index: {}]   ;;  %s1115_s3 = inlined_call_operand.vmem [shape: f32[16,16], index: 3, kind: input, shape index: {}]   ;;  %s1116_s4 = inlined_call_operand.vmem [shape: bf16[4,16], index: 4, kind: input, shape index: {}]   ;;  %s1117_s5 = inlined_call_operand.vmem [shape: f32[4,1], index: 5, kind: input, shape index: {}]   ;;  %s1118_s6 = inlined_call_operand.hbm [shape: f32[2,4,256], index: 6, kind: output, shape index: {}]  }
   0x1   :  { %13 = vsyncpa [#allocation3 + $0x1], 0  ;;  %s954_s21 = smov 0   ;;  %s956_s22 = smov 0  }
   0x2   :  { %s958_s23 = smov 0   ;;  %s960_s24 = smov 0  }
   0x3 LB: > { %s975_s25 = sadd.s32 4294967295, %s915_s24   ;;  %s755_s26 = sadd.s32 4294967294, %s915_s24   ;;  %s915_s24 = sphi %s960_s24, %s1124_s24   ;;  %s911_s23 = sphi %s958_s23, %s1123_s23   ;;  %s907_s22 = sphi %s956_s22, %s1122_s22   ;;  %s903_s21 = sphi %s954_s21, %s1121_s21  }
   0x4   : > { %s979_s27 = sadd.s32 1, %s915_s24   ;;  %s157_s28 = sadd.s32 1, %s911_s23 }
   0x5   : > { %s154_s29 = ssub.s32 %s915_s24, %s979_s27  ;;  %p167_p0 = scmp.ne.s32.totalorder %s911_s23, %s907_s22 }
   0x6   : > { %p155_p1 = scmp.eq.s32.totalorder %s154_s29, 0  ;;  %p168_p2 = scmp.eq.s32.totalorder %s975_s25, 1 }
   0x7   : > { %p173_p3 = scmp.ne.s32.totalorder %s907_s22, %s903_s21  ;;  %p174_p4 = scmp.eq.s32.totalorder %s755_s26, 1 }
   0x8   : > { %s990_s30 = scalar_select %p155_p1, %s911_s23, %s157_s28  }
   0x9   : > { %p992_p5 = por %p168_p2, %p167_p0  ;;  %p996_p6 = por %p174_p4, %p173_p3 }
   0xa   : > { %p758_p7 = scmp.ge.s32.totalorder %s915_s24, 1  ;;  %p215_p8 = scmp.lt.s32.totalorder %s915_s24, 3 }
   0xc   : > { %p216_p9 = pnand %p758_p7, %p215_p8 }
   0xd   : > { %p245_p10 = scmp.lt.s32.totalorder (!%p216_p9), %s975_s25, 1  ;;  %v917_v0 = vmov (!%p216_p9), 0   ;;  %v263_v1 = vld [vmem:[%s1114_s2] sm:$0xff] (!%p216_p9)  ;;  %v264_v2 = vld [vmem:[%s1114_s2 + $0x8] sm:$0xff] (!%p216_p9)  ;;  %vm324_vm0 = vcmask (!%p216_p9), 1041408   ;;  %vm314_vm1 = vcmask (!%p216_p9), 31744  }
   0xe   : > { %219 = sbr.rel (%p216_p9) target bundleno = 1222 (0x4c6), region = 44  ;;  %363 = vmatprep.mubr.bf16.mxu0 (!%p216_p9), %v917_v0  ;;  %819 = vset.pattern.permute.xlu0 (!%p216_p9), %v917_v0  ;;  %v267_v8 = vld [vmem:[%s1114_s2 + $0x20] sm:$0xff] (!%p216_p9)  ;;  %v823_v10 = vld [vmem:[%s1113_s1 + $0x8] sm:$0xff] (!%p216_p9)   ;;  %v824_v11 = vld [vmem:[%s1113_s1 + $0x10] sm:$0xff] (!%p216_p9)   ;;  %vm574_vm2 = vcmask (!%p216_p9), 130048   ;;  %s242_s10 = sand.u32 (!%p216_p9), 1, %s907_s22  }
   0xf   : > { %820 = vset.pattern.permute.xlu1 (!%p216_p9), %v917_v0  ;;  %271 = vperm.xlu0 (!%p216_p9), %819, %v263_v1   ;;  %v822_v9 = vld [vmem:[%s1113_s1] sm:$0xff] (!%p216_p9)   ;;  %v268_v30 = vld [vmem:[%s1114_s2 + $0x28] sm:$0xff] (!%p216_p9)  ;;  %v265_v33 = vld [vmem:[%s1114_s2 + $0x10] sm:$0xff] (!%p216_p9)  ;;  %s759_s11 = sshll.u32 (!%p216_p9), %s242_s10, 3  ;;  %s682_s18 = scalar_lea.sflag (!%p216_p9), [#allocation3], %s242_s10 }
  0x10   : > { %v266_v34 = vld [vmem:[%s1114_s2 + $0x18] sm:$0xff] (!%p216_p9)  ;;  %s244_s13 = scalar_lea.vmem (!%p216_p9), [#allocation2], %s759_s11 }
  0x11   : > { %s696_s14 = sshll.u32 (!%p216_p9), %s244_s13, 4  ;;  %s1072_s14 = int_to_ptr.vmem [resolvable:$true] %s696_s14 }
  0x12   : > { %s853_s19 = scalar_lea.vmem (!%p216_p9), %s1072_s14, 128 }
  0x13   : > { %276 = vperm.xlu0 (!%p216_p9), %819, %v264_v2   ;;  %p854_p11 = scmp.ne.s32.totalorder (!%p216_p9), %s1072_s14, %s853_s19 }
  0x15   : > { %s246_s9 = scalar_select %p245_p10, %s975_s25, 1 }
  0x16   : > { %p855_p12 = pnand %p854_p11, %p992_p5 }
  0x17   : > { %s776_s12 = sshll.u32 %s246_s9, 3  ;;  %291 = vperm.xlu0 %819, %v267_v8  }
  0x18   : > { %s249_s15 = scalar_lea.vmem %s1112_s0, %s776_s12  ;;  %s777_s12 = sshll.u32 %s975_s25, 7 }
  0x19   : > { %v1016_v3 = vld [vmem:[%s249_s15] sm:$0xff]  ;;  %s1070_s17 = scalar_lea.hbm %s1118_s6, %s777_s12  ;;  %p856_p13 = pneg %p855_p12 }
  0x1a   : > { %v1020_v4 = vcombine.high %v1016_v3, %v1016_v3  ;;  %v255_v5 = vpack.c.bf16 %v1016_v3, %v1016_v3  ;;  %s918_s25 = smov [#allocation2]  }
  0x1b   : > { %s857_s20 = sshll.u32 %s918_s25, 4  ;;  %s858_s20 = int_to_ptr.vmem [resolvable:$false] %s857_s20 }
  0x1c   : > { %v256_v6 = vpack.c.bf16 %v1020_v4, %v1020_v4  ;;  %v326_v7 = vsel %vm324_vm0, %v255_v5, 0  ;;  %s859_s26 = scalar_lea.vmem %s858_s20, 256  ;;  %p860_p0 = scmp.lt.s32.totalorder %s1072_s14, %s858_s20 }
  0x1d   : > { %p861_p1 = scmp.lt.s32.totalorder %s859_s26, %s853_s19 }
  0x1e   : > { %765 = vmatprep.subr.msk.bf16.mxu0 %vm324_vm0, %v256_v6 }
  0x1f   : > { %332 = vmatpush1.bf16.msra.mxu0 %v326_v7  ;;  %p862_p2 = por %p861_p1, %p860_p0 }
  0x21   : > { %p863_p3 = pnand %p862_p2, %p856_p13 }
  0x22   : > { %766 = vmatmul.mubr.msk.bf16.vlgmr.msra.gmra.mrb[0].mxu0 %vm314_vm1, %v822_v9 }
  0x23   : > { %373 = vmatprep.mubr.bf16.mxu0 %v917_v0 }
  0x2a   : > { %767 = vmatmul.mubr.msk.bf16.gmra.mrb[4].mxu0 %vm314_vm1, %v823_v10 }
  0x2b   : > { %383 = vmatprep.mubr.bf16.mxu0 %v917_v0 }
  0x32   : > { %768 = vmatmul.mubr.msk.bf16.gmra.mrb[8].mxu0 %vm314_vm1, %v824_v11 }
  0x8e   : > { %v272_v12 = vpop.permute.xlu0 %271 }
  0x92   : > { %v277_v18 = vpop.permute.xlu0 %276 }
  0x96   : > { %v292_v43 = vpop.permute.xlu0 %291 }
  0xf5   : > { %v365_v13 = vpop.f32.mrb[0].mxu0 }
  0xf6   : > { %v366_v14 = vadd.f32 %v365_v13, %v272_v12  ;;  %v367_v15 = vpop.f32.mrb[1].mxu0 }
  0xf7   : > { %v368_v16 = vadd.f32 %v367_v15, %v272_v12  ;;  %v369_v17 = vpop.f32.mrb[2].mxu0 }
  0xf8   : > { %v371_v19 = vpop.f32.mrb[3].mxu0  ;;  %v370_v20 = vadd.f32 %v369_v17, %v277_v18 }
  0xf9   : > { %v372_v21 = vadd.f32 %v371_v19, %v277_v18  ;;  %v394_v22 = vmax.f32 %v366_v14, %v368_v16 }
  0xfb   : > { %395 = vmax.xlane.f32.xlu1 %v394_v22  ;;  %v397_v23 = vmax.f32 %v370_v20, %v372_v21 }
  0xfd   : > { %v375_v24 = vpop.f32.mrb[4].mxu0 }
  0xfe   : > { %v377_v25 = vpop.f32.mrb[5].mxu0 }
  0xff   : > { %398 = vmax.xlane.f32.xlu1 %v397_v23  ;;  %v379_v26 = vpop.f32.mrb[6].mxu0 }
 0x100   : > { %v381_v27 = vpop.f32.mrb[7].mxu0 }
 0x105   : > { %v385_v28 = vpop.f32.mrb[8].mxu0 }
 0x106   : > { %v387_v29 = vpop.f32.mrb[9].mxu0  ;;  %v386_v46 = vadd.f32 %v385_v28, %v292_v43 }
 0x107   : > { %v389_v31 = vpop.f32.mrb[10].mxu0  ;;  %v388_v48 = vadd.f32 %v387_v29, %v292_v43 }
 0x108   : > { %v391_v32 = vpop.f32.mrb[11].mxu0 }
 0x110   : > { %296 = vperm.xlu1 %820, %v268_v30  }
 0x114   : > { %281 = vperm.xlu1 %820, %v265_v33  }
 0x118   : > { %286 = vperm.xlu1 %820, %v266_v34  }
 0x188   : > { %v396_v35 = vpop.xlane.xlu1 %395 }
 0x189   : > { %v400_v36 = vsub.f32 %v366_v14, %v396_v35  ;;  %v401_v37 = vsub.f32 %v368_v16, %v396_v35 }
 0x18b   : > { %v404_v38 = vmul.f32 1.442695, %v400_v36  ;;  %v406_v39 = vmul.f32 1.442695, %v401_v37 }
 0x18c   : > { %v399_v40 = vpop.xlane.xlu1 %398 }
 0x18d   : > { %825 = vpow2.f32 %v404_v38  ;;  %v402_v41 = vsub.f32 %v370_v20, %v399_v40  ;;  %v403_v42 = vsub.f32 %v372_v21, %v399_v40  ;;  %v624_v38 = vld [vmem:[%s1117_s5] sm:$0xf] }
 0x18e   : > { %827 = vpow2.f32 %v406_v39 }
 0x18f   : > { %v408_v44 = vmul.f32 1.442695, %v402_v41  ;;  %v410_v45 = vmul.f32 1.442695, %v403_v42 }
 0x190   : > { %v297_v47 = vpop.permute.xlu1 %296 }
 0x191   : > { %829 = vpow2.f32 %v408_v44  ;;  %v390_v49 = vadd.f32 %v389_v31, %v297_v47  ;;  %v392_v50 = vadd.f32 %v391_v32, %v297_v47 }
 0x192   : > { %831 = vpow2.f32 %v410_v45 }
 0x193   : > { %v489_v51 = vpack.c.bf16 %v392_v50, %v388_v48  ;;  %v488_v52 = vpack.c.bf16 %v390_v49, %v386_v46 }
 0x194   : > { %v282_v53 = vpop.permute.xlu1 %281 }
 0x195   : > { %v376_v54 = vadd.f32 %v375_v24, %v282_v53  ;;  %v378_v55 = vadd.f32 %v377_v25, %v282_v53  ;;  %490 = vmatprep.subr.bf16.mxu1 %v489_v51 }
 0x196   : > { %491 = vmatpush1.bf16.xpose.msra.mxu1 %v488_v52 }
 0x197   : > { %v826_v56 = vpop.eup %825  ;;  %v418_v57 = vrot.slane %v376_v54, 4  ;;  %v424_v58 = vrot.slane %v378_v55, 4 }
 0x198   : > { %v828_v59 = vpop.eup %827  ;;  %v287_v60 = vpop.permute.xlu1 %286 }
 0x199   : > { %v419_v61 = vmax.f32 %v376_v54, %v418_v57  ;;  %v425_v62 = vmax.f32 %v378_v55, %v424_v58  ;;  %v380_v63 = vadd.f32 %v379_v26, %v287_v60  ;;  %v382_v1 = vadd.f32 %v381_v27, %v287_v60 }
 0x19a   : > { %v412_v2 = vadd.f32 %v828_v59, %v826_v56 }
 0x19b   : > { %v830_v5 = vpop.eup %829  ;;  %v420_v6 = vrot.slane %v419_v61, 2  ;;  %v426_v7 = vrot.slane %v425_v62, 2  ;;  %v430_v8 = vrot.slane %v380_v63, 4  ;;  %v436_v9 = vrot.slane %v382_v1, 4 }
 0x19c   : > { %v832_v10 = vpop.eup %831  ;;  %413 = vadd.xlane.f32.xlu0 %v412_v2  ;;  %v486_v11 = vpack.c.bf16 %v830_v5, %v826_v56 }
 0x19d   : > { %v421_v12 = vmax.f32 %v419_v61, %v420_v6  ;;  %v427_v13 = vmax.f32 %v425_v62, %v426_v7  ;;  %v431_v14 = vmax.f32 %v380_v63, %v430_v8  ;;  %v437_v15 = vmax.f32 %v382_v1, %v436_v9 }
 0x19e   : > { %v487_v16 = vpack.c.bf16 %v832_v10, %v828_v59  ;;  %v415_v17 = vadd.f32 %v832_v10, %v830_v5 }
 0x19f   : > { %v422_v18 = vrot.slane %v421_v12, 1  ;;  %v428_v19 = vrot.slane %v427_v13, 1  ;;  %v432_v20 = vrot.slane %v431_v14, 2  ;;  %v438_v21 = vrot.slane %v437_v15, 2 }
 0x1a0   : > { %522 = vmatprep.mubr.bf16.mxu1 %v487_v16  ;;  %416 = vadd.xlane.f32.xlu1 %v415_v17 }
 0x1a1   : > { %v423_v22 = vmax.f32 %v421_v12, %v422_v18  ;;  %v429_v23 = vmax.f32 %v427_v13, %v428_v19  ;;  %v433_v24 = vmax.f32 %v431_v14, %v432_v20  ;;  %v439_v25 = vmax.f32 %v437_v15, %v438_v21  ;;  %523 = vmatmul.mubr.bf16.vlgmr.msra.gmra.mrb[0].mxu1 %v486_v11  ;;  %v531_v18 = vld [vmem:[%s1115_s3] sm:$0xff]  ;;  %v532_v20 = vld [vmem:[%s1115_s3 + $0x8] sm:$0xff] }
 0x1a2   : > { %610 = vmatprep.mubr.bf16.mxu1 %v917_v0 }
 0x1a3   : > { %v442_v26 = vsub.f32 %v376_v54, %v423_v22  ;;  %v443_v27 = vsub.f32 %v378_v55, %v429_v23  ;;  %v434_v28 = vrot.slane %v433_v24, 1  ;;  %v440_v29 = vrot.slane %v439_v25, 1 }
 0x1a5   : > { %v446_v30 = vmul.f32 1.442695, %v442_v26  ;;  %v448_v31 = vmul.f32 1.442695, %v443_v27  ;;  %v435_v32 = vmax.f32 %v433_v24, %v434_v28  ;;  %v441_v33 = vmax.f32 %v439_v25, %v440_v29 }
 0x1a7   : > { %833 = vpow2.f32 %v446_v30  ;;  %v444_v34 = vsub.f32 %v380_v63, %v435_v32  ;;  %v445_v35 = vsub.f32 %v382_v1, %v441_v33 }
 0x1a8   : > { %835 = vpow2.f32 %v448_v31 }
 0x1a9   : > { %v450_v36 = vmul.f32 1.442695, %v444_v34  ;;  %v452_v37 = vmul.f32 1.442695, %v445_v35 }
 0x1ab   : > { %837 = vpow2.f32 %v450_v36 }
 0x1ac   : > { %839 = vpow2.f32 %v452_v37 }
 0x1b1   : > { %v834_v39 = vpop.eup %833  ;;  %627 = vperm.xlu1 %820, %v624_v38  }
 0x1b2   : > { %v836_v40 = vpop.eup %835  ;;  %v454_v41 = vrot.slane %v834_v39, 4 }
 0x1b3   : > { %v460_v42 = vrot.slane %v836_v40, 4 }
 0x1b4   : > { %v455_v43 = vadd.f32 %v834_v39, %v454_v41 }
 0x1b5   : > { %v838_v44 = vpop.eup %837  ;;  %v461_v45 = vadd.f32 %v836_v40, %v460_v42 }
 0x1b6   : > { %v840_v46 = vpop.eup %839  ;;  %v456_v47 = vrot.slane %v455_v43, 2  ;;  %v466_v48 = vrot.slane %v838_v44, 4 }
 0x1b7   : > { %v462_v49 = vrot.slane %v461_v45, 2  ;;  %v472_v50 = vrot.slane %v840_v46, 4 }
 0x1b8   : > { %v457_v51 = vadd.f32 %v456_v47, %v455_v43  ;;  %v467_v52 = vadd.f32 %v838_v44, %v466_v48 }
 0x1b9   : > { %v463_v53 = vadd.f32 %v462_v49, %v461_v45  ;;  %v473_v54 = vadd.f32 %v840_v46, %v472_v50 }
 0x1ba   : > { %v458_v55 = vrot.slane %v457_v51, 1  ;;  %v468_v56 = vrot.slane %v467_v52, 2 }
 0x1bb   : > { %v464_v57 = vrot.slane %v463_v53, 1  ;;  %v474_v58 = vrot.slane %v473_v54, 2 }
 0x1bc   : > { %v459_v59 = vadd.f32 %v458_v55, %v457_v51  ;;  %v469_v60 = vadd.f32 %v468_v56, %v467_v52 }
 0x1bd   : > { %v465_v61 = vadd.f32 %v464_v57, %v463_v53  ;;  %v475_v62 = vadd.f32 %v474_v58, %v473_v54 }
 0x1be   : > { %v470_v63 = vrot.slane %v469_v60, 1  ;;  %841 = vrcp.f32 %v459_v59 }
 0x1bf   : > { %v476_v1 = vrot.slane %v475_v62, 1  ;;  %843 = vrcp.f32 %v465_v61 }
 0x1c0   : > { %v471_v2 = vadd.f32 %v470_v63, %v469_v60 }
 0x1c1   : > { %v477_v5 = vadd.f32 %v476_v1, %v475_v62 }
 0x1c2   : > { %845 = vrcp.f32 %v471_v2 }
 0x1c3   : > { %847 = vrcp.f32 %v477_v5 }
 0x1c8   : > { %v842_v6 = vpop.eup %841 }
 0x1c9   : > { %v844_v7 = vpop.eup %843  ;;  %v482_v10 = vmul.f32 %v842_v6, %v834_v39  ;;  %v621_v39 = vld [vmem:[%s1116_s4] sm:$0x3] }
 0x1ca   : > { %v483_v12 = vmul.f32 %v844_v7, %v836_v40 }
 0x1cc   : > { %v846_v8 = vpop.eup %845 }
 0x1cd   : > { %v848_v9 = vpop.eup %847  ;;  %v484_v11 = vmul.f32 %v846_v8, %v838_v44 }
 0x1ce   : > { %v485_v13 = vmul.f32 %v848_v9, %v840_v46 }
 0x1cf   : > { %v572_v14 = vpack.c.bf16 %v484_v11, %v482_v10 }
 0x1d0   : > { %v573_v15 = vpack.c.bf16 %v485_v13, %v483_v12 }
 0x1d2   : > { %578 = vmatprep.subr.bf16.mxu1 %v573_v15 }
 0x1d3   : > { %579 = vmatpush1.bf16.msra.mxu1 %v572_v14 }
 0x229   : > { %v414_v16 = vpop.xlane.xlu0 %413 }
 0x22a   : > { %849 = vrcp.f32 %v414_v16 }
 0x22d   : > { %v417_v17 = vpop.xlane.xlu1 %416 }
 0x22e   : > { %851 = vrcp.f32 %v417_v17 }
 0x231   : > { %v628_v40 = vpop.permute.xlu1 %627 }
 0x234   : > { %v850_v23 = vpop.eup %849 }
 0x238   : > { %v852_v28 = vpop.eup %851 }
 0x274   : > { %v524_v19 = vpop.f32.mrb[0].mxu1 }
 0x275   : > { %v533_v21 = vmul.f32 %v531_v18, %v524_v19  ;;  %v526_v22 = vpop.f32.mrb[1].mxu1 }
 0x276   : > { %v527_v24 = vpop.f32.mrb[2].mxu1 }
 0x277   : > { %v537_v25 = vmul.f32 %v850_v23, %v533_v21  ;;  %v534_v26 = vmul.f32 %v532_v20, %v527_v24  ;;  %v529_v27 = vpop.f32.mrb[3].mxu1 }
 0x279   : > { %539 = vxpose.xlu0.b32.start [1/2] (short) (narrow) %v537_v25, 16  ;;  %v538_v29 = vmul.f32 %v852_v28, %v534_v26 }
 0x27d   : > { %540 = vxpose.xlu0.b32.end [2/2] (short) (narrow) %v538_v29, 16 }
 0x2f9   : > { %v555_v30 = vpop.trf.xlu0 }
 0x2fd   : > { %v556_v31 = vpop.trf.xlu0 }
 0x2fe   : > { %v571_v32 = vpack.c.bf16 %v556_v31, %v555_v30 }
 0x300   : > { %769 = vmatmul.mubr.msk.bf16.vlgmr.msra.gmra.mrb[4].mxu1 %vm574_vm2, %v571_v32 }
 0x301   : > { %665 = vmatprep.mubr.bf16.mxu1 %v917_v0 }
 0x3d3   : > { %v612_v33 = vpop.f32.mrb[4].mxu1 }
 0x3d4   : > { %v614_v34 = vpop.f32.mrb[5].mxu1 }
 0x3d5   : > { %v616_v35 = vpop.f32.mrb[6].mxu1 }
 0x3d6   : > { %v622_v36 = vpack.c.bf16 %v616_v35, %v612_v33  ;;  %v618_v37 = vpop.f32.mrb[7].mxu1 }
 0x3d7   : > { %v623_v38 = vpack.c.bf16 %v618_v37, %v614_v34 }
 0x3d9   : > { %633 = vmatprep.subr.bf16.mxu1 %v623_v38 }
 0x3da   : > { %634 = vmatpush1.bf16.msra.mxu1 %v622_v36 }
 0x3dd   : > { %770 = vmatmul.mubr.msk.bf16.vlgmr.msra.gmra.mrb[8].mxu1 %vm574_vm2, %v621_v39 }
 0x4b0   : > { %v667_v41 = vpop.f32.mrb[8].mxu1 }
 0x4b1   : > { %v668_v42 = vadd.f32 %v667_v41, %v628_v40  ;;  %v669_v0 = vpop.f32.mrb[9].mxu1 }
 0x4b2   : > { %v670_v43 = vadd.f32 %v669_v0, %v628_v40  ;;  %v671_v44 = vpop.f32.mrb[10].mxu1 }
 0x4b3   : > { %v674_v45 = vadd.f32 %v668_v42, %v1016_v3  ;;  %v672_v46 = vpop.f32.mrb[11].mxu1 }
 0x4b4   : > { %v675_v47 = vadd.f32 %v670_v43, %v1020_v4 }
 0x4b6   : > { %v678_v48 = vcombine.low %v674_v45, %v675_v47 }
 0x4b8   : > { %680 = vst [vmem:[%s244_s13] sm:$0xff] %v678_v48 }
 0x4b9   : > { %866 = shalt.err (!%p863_p3)
}
 0x4ba   : > { %s867_s28 = scalar_lea.hbm %s1070_s17, 128  ;;  %s871_s10 = scalar_lea.hbm %s1118_s6, 256 }
 0x4bb   : > { %p868_p4 = scmp.ne.s32.totalorder %s1070_s17, %s867_s28  ;;  %p872_p9 = scmp.lt.u32.totalorder %s1070_s17, %s1118_s6 }
 0x4bc   : > { %p873_p10 = scmp.lt.u32.totalorder %s871_s10, %s867_s28  ;;  %p875_p12 = scmp.lt.u32.totalorder %s867_s28, %s1070_s17 }
 0x4bd   : > { %p869_p7 = pnand %p868_p4, %p992_p5 }
 0x4be   : > { %p874_p11 = por %p873_p10, %p872_p9 }
 0x4bf   : > { %p870_p8 = pneg %p869_p7 }
 0x4c0   : > { %p876_p13 = por %p875_p12, %p874_p11 }
 0x4c2   : > { %p877_p0 = pnand %p876_p13, %p870_p8 }
 0x4c4   : > { %880 = shalt.err (!%p877_p0)
}
 0x4c5   : > { %778 = dma.vmem_to_hbm [thread:$0]  (%p992_p5), %s1072_s14, 128, %s1070_s17, %s682_s18  }
 0x4c6 PF: > { %p784_p1 = scmp.ge.s32.totalorder %s915_s24, 2  ;;  %s708_s13 = sand.u32 1, %s903_s21  }
 0x4c7   : > { %s709_s15 = scalar_lea.sflag [#allocation3], %s708_s13 }
 0x4c8   : > { %p781_p2 = pnand %p784_p1, %p996_p6 }
 0x4ca   : > { %898 = dma.done.wait (!%p781_p2), %s709_s15, 128  }
 0x4cb   : > { %900 = vsyncadd (!%p781_p2), %s709_s15, 4294967168  ;;  %p16_p3 = scmp.ge.s32.totalorder %s979_s27, 4   ;;  %s1121_s21 = smov %s907_s22 }
 0x4cc   : > { %s1122_s22 = smov %s911_s23  ;;  %s1123_s23 = smov %s990_s30 }
 0x4cd   : > { %s1124_s24 = smov %s979_s27  ;;  %18 = sbr.rel (!%p16_p3) target bundleno = 3 (0x3), region = 79 }
 0x4d4   :  { %714 = vsyncpa [#allocation3], 1 }
 0x4d5   :  { %716 = vsyncpa [#allocation3 + $0x1], 1 }

</bundles_post_ra>
